<compile_context>
chip_gen: v7x
topology: tpu7x:2x2x1
jax: 0.10.0
libtpu: 0.0.40
codegen_flags: <defaults>
</compile_context>

<pallas_src>
import numpy as np
import jax
import jax.numpy as jnp
from jax.experimental import pallas as pl
from jax.experimental.pallas import tpu as pltpu

# Lane-width candidates (multiples of 128); wider rows -> longer contiguous DMAs.
_COL_CANDIDATES = (2048, 1024, 512, 256, 128)
_TARGET_TILE_BYTES = 4 * 1024 * 1024     # ~4 MiB/tile; 2 bufs x (in+out) = 16 MiB


def _h_swish_kernel(x_ref, o_ref):
    x = x_ref[...]
    if x.dtype != jnp.float32 and x.dtype != jnp.bfloat16:
        x = x.astype(jnp.float32)
    # h_swish(x) = x * relu6(x + 3) / 6   (VPU only)
    y = x * jnp.clip(x + 3.0, 0.0, 6.0) / 6.0
    o_ref[...] = y.astype(o_ref.dtype)


def _choose_layout(n, itemsize):
    """Pick (rows, cols, block_rows) with cols a multiple-of-128 divisor of n."""
    cols = None
    for c in _COL_CANDIDATES:
        if n % c == 0:
            cols = c
            break
    if cols is None:
        return None
    rows = n // cols

    # ~_TARGET_TILE_BYTES per block, sublane-aligned (multiple of 8).
    br = (_TARGET_TILE_BYTES // (cols * itemsize)) // 8 * 8
    br = max(8, br)
    if rows > 8:
        # Keep at least 2 grid steps so both v7x TensorCores get work.
        half = (((rows + 1) // 2) + 7) // 8 * 8
        br = min(br, half)
    if br >= rows:
        br = rows                      # single full-dim block (valid even if rows < 8)
    return rows, cols, br


def h_swish_forward(x, *, donate_input=False):
    """Elementwise h_swish over an arbitrarily shaped array."""
    shape = x.shape
    dtype = x.dtype
    n = int(np.prod(shape)) if shape else 1
    itemsize = np.dtype(dtype).itemsize

    layout = _choose_layout(n, itemsize)
    if layout is None:
        # Rare case: total size not a multiple of 128.  Fall back to a padded
        # layout (costs one extra HBM pass, only for un-tileable sizes).
        cols = 128
        rows = pl.cdiv(n, cols)
        br = max(8, (_TARGET_TILE_BYTES // (cols * itemsize)) // 8 * 8)
        if br >= rows:
            br = rows
        x2 = jnp.pad(jnp.ravel(x), (0, rows * cols - n)).reshape(rows, cols)
        ragged_pad = True
    else:
        rows, cols, br = layout
        x2 = x.reshape(rows, cols)     # metadata-only for contiguous row-major
        ragged_pad = False

    extra = {"input_output_aliases": {0: 0}} if donate_input else {}

    out2 = pl.pallas_call(
        _h_swish_kernel,
        out_shape=jax.ShapeDtypeStruct((rows, cols), dtype),
        grid=(pl.cdiv(rows, br),),                       # masked partial last block
        in_specs=[pl.BlockSpec((br, cols), lambda i: (i, 0))],
        out_specs=pl.BlockSpec((br, cols), lambda i: (i, 0)),
        compiler_params=pltpu.CompilerParams(
            dimension_semantics=("parallel",),
            vmem_limit_bytes=32 * 1024 * 1024),
        **extra,
    )(x2)

    if ragged_pad:
        return out2.reshape(-1)[:n].reshape(shape)
    return out2.reshape(shape)


def reference_h_swish(x):
    """Pure-JAX reference mirroring the PyTorch forward."""
    xf = x.astype(jnp.float32)
    return (xf * jnp.clip(xf + 3.0, 0.0, 6.0) / 6.0).astype(x.dtype)


if __name__ == "__main__":
    key = jax.random.PRNGKey(0)
    k1, k2 = jax.random.split(key)

    # Small NCHW activation (the shape the yolov5 module actually sees).
    x1 = jax.random.normal(k1, (2, 4, 16, 16), jnp.float32) * 4.0
    out1 = jax.block_until_ready(h_swish_forward(x1))
    np.testing.assert_allclose(np.asarray(out1), np.asarray(reference_h_swish(x1)),
                               rtol=1e-6, atol=1e-6)

    # Shape whose flattened length exercises the multi-step grid and the
    # masked partial last block (9600 elements -> 75 x 128, blocks of 40 rows).
    x2 = jax.random.normal(k2, (2, 3, 40, 40), jnp.float32) * 4.0
    out2 = jax.block_until_ready(h_swish_forward(x2))
    np.testing.assert_allclose(np.asarray(out2), np.asarray(reference_h_swish(x2)),
                               rtol=1e-6, atol=1e-6)

    print("KERNEL_OK")
</pallas_src>

<mosaic_0001>
module attributes {stable_mosaic.version = 11 : i64} {
  func.func @_h_swish_kernel(%arg0: i32, %arg1: memref<1x2048xf32, #tpu.memory_space<vmem>>, %arg2: memref<1x2048xf32, #tpu.memory_space<vmem>>) attributes {dimension_semantics = [#tpu.dimension_semantics<parallel>], iteration_bounds = array<i64: 1>, scalar_prefetch = 0 : i64, scratch_operands = 0 : i64, tpu.core_type = #tpu.core_type<tc>, window_params = [{transform_indices = @transform_0, window_bounds = array<i64: 1, 2048>}, {transform_indices = @transform_1, window_bounds = array<i64: 1, 2048>}]} {
    %c0 = arith.constant 0 : index
    %c0_0 = arith.constant 0 : index
    %0 = vector.load %arg1[%c0, %c0_0] : memref<1x2048xf32, #tpu.memory_space<vmem>>, vector<1x2048xf32>
    %cst = arith.constant 3.000000e+00 : f32
    %1 = vector.broadcast %cst : f32 to vector<1x2048xf32>
    %2 = arith.addf %0, %1 : vector<1x2048xf32>
    %cst_1 = arith.constant 0.000000e+00 : f32
    %cst_2 = arith.constant 6.000000e+00 : f32
    %3 = vector.broadcast %cst_1 : f32 to vector<1x2048xf32>
    %4 = arith.maximumf %3, %2 : vector<1x2048xf32>
    %5 = vector.broadcast %cst_2 : f32 to vector<1x2048xf32>
    %6 = arith.minimumf %5, %4 : vector<1x2048xf32>
    %7 = arith.mulf %0, %6 : vector<1x2048xf32>
    %cst_3 = arith.constant 6.000000e+00 : f32
    %8 = vector.broadcast %cst_3 : f32 to vector<1x2048xf32>
    %9 = arith.divf %7, %8 : vector<1x2048xf32>
    %c0_4 = arith.constant 0 : index
    %c0_5 = arith.constant 0 : index
    %10 = vector.load %arg2[%c0_4, %c0_5] : memref<1x2048xf32, #tpu.memory_space<vmem>>, vector<1x2048xf32>
    tpu.vector_store %arg2[%c0_4, %c0_5], %9 {strides = array<i32>} : memref<1x2048xf32, #tpu.memory_space<vmem>>, vector<1x2048xf32>,
    return
  }
  func.func @transform_0(%arg0: i32) -> (i32, i32) {
    %c0_i32 = arith.constant 0 : i32
    %c0_i32_0 = arith.constant 0 : i32
    return %arg0, %c0_i32 : i32, i32
  }
  func.func @transform_1(%arg0: i32) -> (i32, i32) {
    %c0_i32 = arith.constant 0 : i32
    %c0_i32_0 = arith.constant 0 : i32
    return %arg0, %c0_i32 : i32, i32
  }
}

</mosaic_0001>

<bundles_post_ra>
// kernel: tpu_custom_call.1
= control target key start
LH: loop header
LB: loop body
LE: loop exit
PB: predicated region body
PF: predicated region fallthrough
CT: control target
= control target key end

     0   :  { %6 = vsyncpa [#allocation3], 0  ;;  %s137_s0 = inlined_call_operand.hbm [shape: f32[1,2048], index: 0, kind: input, shape index: {}]   ;;  %s138_s1 = inlined_call_operand.hbm [shape: f32[1,2048], index: 1, kind: output, shape index: {}]  }
   0x1   :  { %7 = vsyncpa [#allocation4], 0  ;;  %s101_s6 = smov [#allocation2]   ;;  %s53_s10 = scalar_lea.hbm %s137_s0, 256 }
   0x2   :  { %s14_s7 = sshll.u32 %s101_s6, 4  ;;  %p54_p0 = scmp.ne.s32.totalorder %s137_s0, %s53_s10  ;;  %s15_s7 = int_to_ptr.vmem [resolvable:$true] %s14_s7 }
   0x3   :  { %p57_p1 = scmp.lt.u32.totalorder %s53_s10, %s137_s0 }
   0x5   :  { %p59_p2 = pnand %p57_p1, %p54_p0 }
   0x7   :  { %62 = shalt.err (!%p59_p2)
}
   0x8   :  { %s63_s15 = scalar_lea.vmem %s15_s7, 256  ;;  %p68_p4 = scmp.lt.s32.totalorder %s15_s7, %s15_s7 }
   0x9   :  { %p64_p3 = scmp.ne.s32.totalorder %s15_s7, %s63_s15  ;;  %p69_p5 = scmp.lt.s32.totalorder %s63_s15, %s63_s15 }
   0xb   :  { %p70_p6 = por %p69_p5, %p68_p4 }
   0xd   :  { %p71_p7 = pnand %p70_p6, %p64_p3 }
   0xf   :  { %74 = shalt.err (!%p71_p7)
}
  0x10   :  { %17 = dma.hbm_to_vmem [thread:$0]  %s137_s0, 256, %s15_s7, [#allocation3]  }
  0x11   :  { %97 = dma.done.wait [#allocation3], 256  }
  0x12   :  { %98 = vsyncadd [#allocation3], 4294967040  ;;  %v21_v0 = vld [vmem:[#allocation2] sm:$0xff]  ;;  %v22_v1 = vld [vmem:[#allocation2 + $0x8] sm:$0xff]  ;;  %s102_s18 = smov [#allocation5]  }
  0x13   :  { %v23_v2 = vadd.f32 3.0, %v21_v0  ;;  %v24_v3 = vadd.f32 3.0, %v22_v1  ;;  %s42_s19 = sshll.u32 %s102_s18, 4  ;;  %s43_s19 = int_to_ptr.vmem [resolvable:$true] %s42_s19 }
  0x14   :  { %s75_s0 = scalar_lea.vmem %s43_s19, 256  ;;  %p80_p9 = scmp.lt.s32.totalorder %s43_s19, %s43_s19 }
  0x15   :  { %v25_v4 = vmax.f32 %v23_v2, 0.0  ;;  %v26_v5 = vmax.f32 %v24_v3, 0.0  ;;  %p76_p8 = scmp.ne.s32.totalorder %s43_s19, %s75_s0  ;;  %p81_p10 = scmp.lt.s32.totalorder %s75_s0, %s75_s0 }
  0x17   :  { %v27_v6 = vmin.f32 %v25_v4, 6.0  ;;  %v28_v7 = vmin.f32 %v26_v5, 6.0  ;;  %p82_p11 = por %p81_p10, %p80_p9 }
  0x19   :  { %v29_v8 = vmul.f32 %v27_v6, %v21_v0  ;;  %v30_v9 = vmul.f32 %v28_v7, %v22_v1  ;;  %p83_p12 = pnand %p82_p11, %p76_p8 }
  0x1b   :  { %v32_v10 = vmul.f32 0.16666667, %v29_v8  ;;  %v33_v11 = vmul.f32 0.16666667, %v30_v9 }
  0x1d   :  { %34 = vst [vmem:[#allocation5] sm:$0xff] %v32_v10  ;;  %35 = vst [vmem:[#allocation5 + $0x8] sm:$0xff] %v33_v11 }
  0x1e   :  { %86 = shalt.err (!%p83_p12)
}
  0x1f   :  { %s87_s22 = scalar_lea.hbm %s138_s1, 256 }
  0x20   :  { %p88_p13 = scmp.ne.s32.totalorder %s138_s1, %s87_s22  ;;  %p91_p0 = scmp.lt.u32.totalorder %s87_s22, %s138_s1 }
  0x22   :  { %p93_p1 = pnand %p91_p0, %p88_p13 }
  0x24   :  { %96 = shalt.err (!%p93_p1)
}
  0x25   :  { %45 = dma.vmem_to_hbm [thread:$0]  %s43_s19, 256, %s138_s1, [#allocation4]  }
  0x26   :  { %99 = dma.done.wait [#allocation4], 256  }
  0x27   :  { %100 = vsyncadd [#allocation4], 4294967040 }
  0x28   :  { %49 = vsyncpa [#allocation3], 1 }
  0x29   :  { %50 = vsyncpa [#allocation4], 1 }

</bundles_post_ra>
